<compile_context>
chip_gen: v7x
topology: tpu7x:2x2x1
jax: 0.10.0
libtpu: 0.0.40
codegen_flags: <defaults>
</compile_context>

<pallas_src>
import jax
import jax.numpy as jnp
from jax.experimental import pallas as pl
from jax.experimental.pallas import tpu as pltpu


def _round_up(x, m):
    return (x + m - 1) // m * m


def _make_gather_kernel(token_block, ring):
    """Build a gather kernel for a fixed tokens-per-step / DMA-ring depth."""
    mask = ring - 1  # ring is a power of two

    def kernel(ids_ref, w_hbm, o_ref, sem):
        # ids_ref : [N_pad] int32 in SMEM (scalar prefetch)
        # w_hbm   : [V, E_pad] float32, raw HBM ref (no auto-DMA)
        # o_ref   : [TB, E_pad] float32 VMEM output block for this grid step
        # sem     : DMA semaphore ring of depth `ring`
        base = pl.program_id(0) * token_block

        def start_copy(t):
            row = ids_ref[base + t]
            pltpu.make_async_copy(
                w_hbm.at[row], o_ref.at[t], sem.at[t & mask]).start()

        def wait_copy(t):
            # src slice only sets the byte count; any row has the same size.
            pltpu.make_async_copy(
                w_hbm.at[0], o_ref.at[t], sem.at[t & mask]).wait()

        # Prime the ring (static unroll, `ring` is small).
        for t in range(ring):
            start_copy(t)

        # Steady state: retire the oldest in-flight copy, reuse its slot.
        @pl.loop(ring, token_block)
        def _(t):
            wait_copy(t - ring)
            start_copy(t)

        # Drain all outstanding copies before the pipeline writes o_ref back.
        @pl.loop(token_block - ring, token_block)
        def _(t):
            wait_copy(t)

    return kernel


def embedding_lookup(weight_padded, ids, out_width):
    """Pallas embedding gather.

    weight_padded: float32 [V, E_pad], E_pad a multiple of 128 (extra columns
                   beyond `out_width` are zero padding).
    ids:           int array, any shape.
    returns float32 [*ids.shape, out_width]
    """
    ids = jnp.asarray(ids)
    orig_shape = ids.shape
    V, E_pad = weight_padded.shape

    # Clamp ids so a bad token can never drive an out-of-range DMA.
    ids_flat = jnp.clip(ids.reshape(-1).astype(jnp.int32), 0, V - 1)
    N = ids_flat.shape[0]

    # Tokens per grid step: big enough to amortize grid overhead, small enough
    # that the double-buffered (TB, E_pad) f32 output block is a few MiB even
    # on v7x's 64 MiB VMEM.
    token_block = min(1024, _round_up(max(N, 1), 8))
    ring = min(8, token_block)  # always 8 in practice (power of two)

    n_pad = _round_up(max(N, 1), token_block)
    if n_pad != N:
        # Pad with the padding index 0 (row 0 is all zeros anyway).
        ids_flat = jnp.pad(ids_flat, (0, n_pad - N))

    grid = (n_pad // token_block,)
    kernel = _make_gather_kernel(token_block, ring)

    out = pl.pallas_call(
        kernel,
        out_shape=jax.ShapeDtypeStruct((n_pad, E_pad), weight_padded.dtype),
        grid_spec=pltpu.PrefetchScalarGridSpec(
            num_scalar_prefetch=1,
            grid=grid,
            in_specs=[
                # Full table stays in HBM; rows are fetched by manual DMA.
                pl.BlockSpec(memory_space=pl.ANY),
            ],
            out_specs=pl.BlockSpec(
                (token_block, E_pad), lambda i, ids_ref: (i, 0)),
            scratch_shapes=[pltpu.SemaphoreType.DMA((ring,))],
        ),
        compiler_params=pltpu.CompilerParams(
            # Tokens are independent and each output block is written once:
            # let v7x shard the token axis across both TensorCores.
            dimension_semantics=("parallel",),
            vmem_limit_bytes=32 * 1024 * 1024,
        ),
        cost_estimate=pl.CostEstimate(
            flops=0,
            transcendentals=0,
            bytes_accessed=int(2 * n_pad * E_pad * 4),
        ),
    )(ids_flat, weight_padded)

    out = out[:N, :out_width]
    return out.reshape(*orig_shape, out_width)


class Word2Vec:
    """JAX/Pallas port of the PyTorch Word2Vec module (forward pass only)."""

    def __init__(self, key, vocab_size=20000, embedding_size=300,
                 padding_idx=0):
        assert padding_idx == 0, "module hard-codes row 0 as the padding row"
        self.vocab_size = vocab_size
        self.embedding_size = embedding_size
        # Pad the embedding width to a lane-aligned multiple of 128 once, at
        # init time, so every row DMA and output store is (8,128)-tile aligned.
        self.e_pad = _round_up(embedding_size, 128)

        k_i, k_o = jax.random.split(key)
        bound = 0.5 / embedding_size

        def _init_table(k):
            body = jax.random.uniform(
                k, (vocab_size - 1, embedding_size),
                dtype=jnp.float32, minval=-bound, maxval=bound)
            table = jnp.concatenate(
                [jnp.zeros((1, embedding_size), jnp.float32), body], axis=0)
            if self.e_pad != embedding_size:
                table = jnp.pad(
                    table, ((0, 0), (0, self.e_pad - embedding_size)))
            return table  # [V, E_pad], padding columns are zero

        self.ivectors = _init_table(k_i)
        self.ovectors = _init_table(k_o)
        # TODO(synk): training path (negative-sampling loss / grads) is out of
        # scope; only the forward embedding lookups are implemented.

    def forward(self, data):
        return self.forward_i(data)

    def forward_i(self, data):
        return embedding_lookup(self.ivectors, data, self.embedding_size)

    def forward_o(self, data):
        return embedding_lookup(self.ovectors, data, self.embedding_size)


if __name__ == "__main__":
    key = jax.random.PRNGKey(0)
    k_model, k_data = jax.random.split(key)

    # Small shapes consistent with the module: vocab=512, embedding=300
    # (the PyTorch default width, exercising the pad-to-384 path), batch=2,
    # seq=8.
    V, E = 512, 300
    B, S = 2, 8
    model = Word2Vec(k_model, vocab_size=V, embedding_size=E, padding_idx=0)

    data = jax.random.randint(k_data, (B, S), 0, V, dtype=jnp.int32)
    # include the padding index to exercise the zero row
    data = data.at[0, 0].set(0)

    out = model.forward(data)            # forward == forward_i
    out_o = model.forward_o(data)
    jax.block_until_ready(out)
    jax.block_until_ready(out_o)

    # Sanity check against the pure-JAX reference gather.
    ref_i = model.ivectors[:, :E][data]
    ref_o = model.ovectors[:, :E][data]
    assert out.shape == (B, S, E) and out.dtype == jnp.float32
    assert out_o.shape == (B, S, E)
    assert jnp.allclose(out, ref_i), "Pallas gather mismatch vs reference (i)"
    assert jnp.allclose(out_o, ref_o), "Pallas gather mismatch vs reference (o)"
    assert jnp.allclose(out[0, 0], 0.0), "padding row must be zeros"

    print("KERNEL_OK")
</pallas_src>

<mosaic_0001>
module attributes {stable_mosaic.version = 11 : i64} {
  func.func @kernel(%arg0: i32, %arg1: memref<16xi32, #tpu.memory_space<smem>>, %arg2: memref<512x384xf32, #tpu.memory_space<any>>, %arg3: memref<16x384xf32, #tpu.memory_space<vmem>>, %arg4: memref<8x!tpu.dma_semaphore, #tpu.memory_space<semaphore_mem>>) attributes {dimension_semantics = [#tpu.dimension_semantics<parallel>], iteration_bounds = array<i64: 1>, scalar_prefetch = 1 : i64, scratch_operands = 1 : i64, tpu.core_type = #tpu.core_type<tc>, window_params = [{}, {transform_indices = @transform_1, window_bounds = array<i64: 16, 384>}]} {
    %c16_i32 = arith.constant 16 : i32
    %0 = arith.muli %arg0, %c16_i32 : i32
    %c0_i32 = arith.constant 0 : i32
    %1 = arith.addi %0, %c0_i32 : i32
    %2 = arith.index_cast %1 : i32 to index
    %3 = memref.load %arg1[%2] : memref<16xi32, #tpu.memory_space<smem>>
    %c0_i32_0 = arith.constant 0 : i32
    %c0_i32_1 = arith.constant 0 : i32
    %c0_i32_2 = arith.constant 0 : i32
    %4 = tpu.memref_slice %arg2[%3, %c0_i32_2] : memref<512x384xf32, #tpu.memory_space<any>> -> memref<1x384xf32, #tpu.memory_space<any>>
    %5 = tpu.memref_squeeze %4 : memref<1x384xf32, #tpu.memory_space<any>> -> memref<384xf32, #tpu.memory_space<any>>
    %c0_i32_3 = arith.constant 0 : i32
    %6 = tpu.memref_slice %arg3[%c0_i32_0, %c0_i32_3] : memref<16x384xf32, #tpu.memory_space<vmem>> -> memref<1x384xf32, #tpu.memory_space<vmem>>
    %7 = tpu.memref_squeeze %6 : memref<1x384xf32, #tpu.memory_space<vmem>> -> memref<384xf32, #tpu.memory_space<vmem>>
    %8 = tpu.memref_slice %arg4[%c0_i32_1] : memref<8x!tpu.dma_semaphore, #tpu.memory_space<semaphore_mem>> -> memref<1x!tpu.dma_semaphore, #tpu.memory_space<semaphore_mem>>
    %9 = tpu.memref_squeeze %8 : memref<1x!tpu.dma_semaphore, #tpu.memory_space<semaphore_mem>> -> memref<!tpu.dma_semaphore, #tpu.memory_space<semaphore_mem>>
    tpu.enqueue_dma source(%5 : memref<384xf32, #tpu.memory_space<any>>) target(%7 : memref<384xf32, #tpu.memory_space<vmem>>) target_semaphore(%9 : memref<!tpu.dma_semaphore, #tpu.memory_space<semaphore_mem>>)
    %c1_i32 = arith.constant 1 : i32
    %10 = arith.addi %0, %c1_i32 : i32
    %11 = arith.index_cast %10 : i32 to index
    %12 = memref.load %arg1[%11] : memref<16xi32, #tpu.memory_space<smem>>
    %c1_i32_4 = arith.constant 1 : i32
    %c1_i32_5 = arith.constant 1 : i32
    %c0_i32_6 = arith.constant 0 : i32
    %13 = tpu.memref_slice %arg2[%12, %c0_i32_6] : memref<512x384xf32, #tpu.memory_space<any>> -> memref<1x384xf32, #tpu.memory_space<any>>
    %14 = tpu.memref_squeeze %13 : memref<1x384xf32, #tpu.memory_space<any>> -> memref<384xf32, #tpu.memory_space<any>>
    %c0_i32_7 = arith.constant 0 : i32
    %15 = tpu.memref_slice %arg3[%c1_i32_4, %c0_i32_7] : memref<16x384xf32, #tpu.memory_space<vmem>> -> memref<1x384xf32, #tpu.memory_space<vmem>>
    %16 = tpu.memref_squeeze %15 : memref<1x384xf32, #tpu.memory_space<vmem>> -> memref<384xf32, #tpu.memory_space<vmem>>
    %17 = tpu.memref_slice %arg4[%c1_i32_5] : memref<8x!tpu.dma_semaphore, #tpu.memory_space<semaphore_mem>> -> memref<1x!tpu.dma_semaphore, #tpu.memory_space<semaphore_mem>>
    %18 = tpu.memref_squeeze %17 : memref<1x!tpu.dma_semaphore, #tpu.memory_space<semaphore_mem>> -> memref<!tpu.dma_semaphore, #tpu.memory_space<semaphore_mem>>
    tpu.enqueue_dma source(%14 : memref<384xf32, #tpu.memory_space<any>>) target(%16 : memref<384xf32, #tpu.memory_space<vmem>>) target_semaphore(%18 : memref<!tpu.dma_semaphore, #tpu.memory_space<semaphore_mem>>)
    %c2_i32 = arith.constant 2 : i32
    %19 = arith.addi %0, %c2_i32 : i32
    %20 = arith.index_cast %19 : i32 to index
    %21 = memref.load %arg1[%20] : memref<16xi32, #tpu.memory_space<smem>>
    %c2_i32_8 = arith.constant 2 : i32
    %c2_i32_9 = arith.constant 2 : i32
    %c0_i32_10 = arith.constant 0 : i32
    %22 = tpu.memref_slice %arg2[%21, %c0_i32_10] : memref<512x384xf32, #tpu.memory_space<any>> -> memref<1x384xf32, #tpu.memory_space<any>>
    %23 = tpu.memref_squeeze %22 : memref<1x384xf32, #tpu.memory_space<any>> -> memref<384xf32, #tpu.memory_space<any>>
    %c0_i32_11 = arith.constant 0 : i32
    %24 = tpu.memref_slice %arg3[%c2_i32_8, %c0_i32_11] : memref<16x384xf32, #tpu.memory_space<vmem>> -> memref<1x384xf32, #tpu.memory_space<vmem>>
    %25 = tpu.memref_squeeze %24 : memref<1x384xf32, #tpu.memory_space<vmem>> -> memref<384xf32, #tpu.memory_space<vmem>>
    %26 = tpu.memref_slice %arg4[%c2_i32_9] : memref<8x!tpu.dma_semaphore, #tpu.memory_space<semaphore_mem>> -> memref<1x!tpu.dma_semaphore, #tpu.memory_space<semaphore_mem>>
    %27 = tpu.memref_squeeze %26 : memref<1x!tpu.dma_semaphore, #tpu.memory_space<semaphore_mem>> -> memref<!tpu.dma_semaphore, #tpu.memory_space<semaphore_mem>>
    tpu.enqueue_dma source(%23 : memref<384xf32, #tpu.memory_space<any>>) target(%25 : memref<384xf32, #tpu.memory_space<vmem>>) target_semaphore(%27 : memref<!tpu.dma_semaphore, #tpu.memory_space<semaphore_mem>>)
    %c3_i32 = arith.constant 3 : i32
    %28 = arith.addi %0, %c3_i32 : i32
    %29 = arith.index_cast %28 : i32 to index
    %30 = memref.load %arg1[%29] : memref<16xi32, #tpu.memory_space<smem>>
    %c3_i32_12 = arith.constant 3 : i32
    %c3_i32_13 = arith.constant 3 : i32
    %c0_i32_14 = arith.constant 0 : i32
    %31 = tpu.memref_slice %arg2[%30, %c0_i32_14] : memref<512x384xf32, #tpu.memory_space<any>> -> memref<1x384xf32, #tpu.memory_space<any>>
    %32 = tpu.memref_squeeze %31 : memref<1x384xf32, #tpu.memory_space<any>> -> memref<384xf32, #tpu.memory_space<any>>
    %c0_i32_15 = arith.constant 0 : i32
    %33 = tpu.memref_slice %arg3[%c3_i32_12, %c0_i32_15] : memref<16x384xf32, #tpu.memory_space<vmem>> -> memref<1x384xf32, #tpu.memory_space<vmem>>
    %34 = tpu.memref_squeeze %33 : memref<1x384xf32, #tpu.memory_space<vmem>> -> memref<384xf32, #tpu.memory_space<vmem>>
    %35 = tpu.memref_slice %arg4[%c3_i32_13] : memref<8x!tpu.dma_semaphore, #tpu.memory_space<semaphore_mem>> -> memref<1x!tpu.dma_semaphore, #tpu.memory_space<semaphore_mem>>
    %36 = tpu.memref_squeeze %35 : memref<1x!tpu.dma_semaphore, #tpu.memory_space<semaphore_mem>> -> memref<!tpu.dma_semaphore, #tpu.memory_space<semaphore_mem>>
    tpu.enqueue_dma source(%32 : memref<384xf32, #tpu.memory_space<any>>) target(%34 : memref<384xf32, #tpu.memory_space<vmem>>) target_semaphore(%36 : memref<!tpu.dma_semaphore, #tpu.memory_space<semaphore_mem>>)
    %c4_i32 = arith.constant 4 : i32
    %37 = arith.addi %0, %c4_i32 : i32
    %38 = arith.index_cast %37 : i32 to index
    %39 = memref.load %arg1[%38] : memref<16xi32, #tpu.memory_space<smem>>
    %c4_i32_16 = arith.constant 4 : i32
    %c4_i32_17 = arith.constant 4 : i32
    %c0_i32_18 = arith.constant 0 : i32
    %40 = tpu.memref_slice %arg2[%39, %c0_i32_18] : memref<512x384xf32, #tpu.memory_space<any>> -> memref<1x384xf32, #tpu.memory_space<any>>
    %41 = tpu.memref_squeeze %40 : memref<1x384xf32, #tpu.memory_space<any>> -> memref<384xf32, #tpu.memory_space<any>>
    %c0_i32_19 = arith.constant 0 : i32
    %42 = tpu.memref_slice %arg3[%c4_i32_16, %c0_i32_19] : memref<16x384xf32, #tpu.memory_space<vmem>> -> memref<1x384xf32, #tpu.memory_space<vmem>>
    %43 = tpu.memref_squeeze %42 : memref<1x384xf32, #tpu.memory_space<vmem>> -> memref<384xf32, #tpu.memory_space<vmem>>
    %44 = tpu.memref_slice %arg4[%c4_i32_17] : memref<8x!tpu.dma_semaphore, #tpu.memory_space<semaphore_mem>> -> memref<1x!tpu.dma_semaphore, #tpu.memory_space<semaphore_mem>>
    %45 = tpu.memref_squeeze %44 : memref<1x!tpu.dma_semaphore, #tpu.memory_space<semaphore_mem>> -> memref<!tpu.dma_semaphore, #tpu.memory_space<semaphore_mem>>
    tpu.enqueue_dma source(%41 : memref<384xf32, #tpu.memory_space<any>>) target(%43 : memref<384xf32, #tpu.memory_space<vmem>>) target_semaphore(%45 : memref<!tpu.dma_semaphore, #tpu.memory_space<semaphore_mem>>)
    %c5_i32 = arith.constant 5 : i32
    %46 = arith.addi %0, %c5_i32 : i32
    %47 = arith.index_cast %46 : i32 to index
    %48 = memref.load %arg1[%47] : memref<16xi32, #tpu.memory_space<smem>>
    %c5_i32_20 = arith.constant 5 : i32
    %c5_i32_21 = arith.constant 5 : i32
    %c0_i32_22 = arith.constant 0 : i32
    %49 = tpu.memref_slice %arg2[%48, %c0_i32_22] : memref<512x384xf32, #tpu.memory_space<any>> -> memref<1x384xf32, #tpu.memory_space<any>>
    %50 = tpu.memref_squeeze %49 : memref<1x384xf32, #tpu.memory_space<any>> -> memref<384xf32, #tpu.memory_space<any>>
    %c0_i32_23 = arith.constant 0 : i32
    %51 = tpu.memref_slice %arg3[%c5_i32_20, %c0_i32_23] : memref<16x384xf32, #tpu.memory_space<vmem>> -> memref<1x384xf32, #tpu.memory_space<vmem>>
    %52 = tpu.memref_squeeze %51 : memref<1x384xf32, #tpu.memory_space<vmem>> -> memref<384xf32, #tpu.memory_space<vmem>>
    %53 = tpu.memref_slice %arg4[%c5_i32_21] : memref<8x!tpu.dma_semaphore, #tpu.memory_space<semaphore_mem>> -> memref<1x!tpu.dma_semaphore, #tpu.memory_space<semaphore_mem>>
    %54 = tpu.memref_squeeze %53 : memref<1x!tpu.dma_semaphore, #tpu.memory_space<semaphore_mem>> -> memref<!tpu.dma_semaphore, #tpu.memory_space<semaphore_mem>>
    tpu.enqueue_dma source(%50 : memref<384xf32, #tpu.memory_space<any>>) target(%52 : memref<384xf32, #tpu.memory_space<vmem>>) target_semaphore(%54 : memref<!tpu.dma_semaphore, #tpu.memory_space<semaphore_mem>>)
    %c6_i32 = arith.constant 6 : i32
    %55 = arith.addi %0, %c6_i32 : i32
    %56 = arith.index_cast %55 : i32 to index
    %57 = memref.load %arg1[%56] : memref<16xi32, #tpu.memory_space<smem>>
    %c6_i32_24 = arith.constant 6 : i32
    %c6_i32_25 = arith.constant 6 : i32
    %c0_i32_26 = arith.constant 0 : i32
    %58 = tpu.memref_slice %arg2[%57, %c0_i32_26] : memref<512x384xf32, #tpu.memory_space<any>> -> memref<1x384xf32, #tpu.memory_space<any>>
    %59 = tpu.memref_squeeze %58 : memref<1x384xf32, #tpu.memory_space<any>> -> memref<384xf32, #tpu.memory_space<any>>
    %c0_i32_27 = arith.constant 0 : i32
    %60 = tpu.memref_slice %arg3[%c6_i32_24, %c0_i32_27] : memref<16x384xf32, #tpu.memory_space<vmem>> -> memref<1x384xf32, #tpu.memory_space<vmem>>
    %61 = tpu.memref_squeeze %60 : memref<1x384xf32, #tpu.memory_space<vmem>> -> memref<384xf32, #tpu.memory_space<vmem>>
    %62 = tpu.memref_slice %arg4[%c6_i32_25] : memref<8x!tpu.dma_semaphore, #tpu.memory_space<semaphore_mem>> -> memref<1x!tpu.dma_semaphore, #tpu.memory_space<semaphore_mem>>
    %63 = tpu.memref_squeeze %62 : memref<1x!tpu.dma_semaphore, #tpu.memory_space<semaphore_mem>> -> memref<!tpu.dma_semaphore, #tpu.memory_space<semaphore_mem>>
    tpu.enqueue_dma source(%59 : memref<384xf32, #tpu.memory_space<any>>) target(%61 : memref<384xf32, #tpu.memory_space<vmem>>) target_semaphore(%63 : memref<!tpu.dma_semaphore, #tpu.memory_space<semaphore_mem>>)
    %c7_i32 = arith.constant 7 : i32
    %64 = arith.addi %0, %c7_i32 : i32
    %65 = arith.index_cast %64 : i32 to index
    %66 = memref.load %arg1[%65] : memref<16xi32, #tpu.memory_space<smem>>
    %c7_i32_28 = arith.constant 7 : i32
    %c7_i32_29 = arith.constant 7 : i32
    %c0_i32_30 = arith.constant 0 : i32
    %67 = tpu.memref_slice %arg2[%66, %c0_i32_30] : memref<512x384xf32, #tpu.memory_space<any>> -> memref<1x384xf32, #tpu.memory_space<any>>
    %68 = tpu.memref_squeeze %67 : memref<1x384xf32, #tpu.memory_space<any>> -> memref<384xf32, #tpu.memory_space<any>>
    %c0_i32_31 = arith.constant 0 : i32
    %69 = tpu.memref_slice %arg3[%c7_i32_28, %c0_i32_31] : memref<16x384xf32, #tpu.memory_space<vmem>> -> memref<1x384xf32, #tpu.memory_space<vmem>>
    %70 = tpu.memref_squeeze %69 : memref<1x384xf32, #tpu.memory_space<vmem>> -> memref<384xf32, #tpu.memory_space<vmem>>
    %71 = tpu.memref_slice %arg4[%c7_i32_29] : memref<8x!tpu.dma_semaphore, #tpu.memory_space<semaphore_mem>> -> memref<1x!tpu.dma_semaphore, #tpu.memory_space<semaphore_mem>>
    %72 = tpu.memref_squeeze %71 : memref<1x!tpu.dma_semaphore, #tpu.memory_space<semaphore_mem>> -> memref<!tpu.dma_semaphore, #tpu.memory_space<semaphore_mem>>
    tpu.enqueue_dma source(%68 : memref<384xf32, #tpu.memory_space<any>>) target(%70 : memref<384xf32, #tpu.memory_space<vmem>>) target_semaphore(%72 : memref<!tpu.dma_semaphore, #tpu.memory_space<semaphore_mem>>)
    %c0_i32_32 = arith.constant 0 : i32
    %c8_i32 = arith.constant 8 : i32
    %73 = arith.addi %c0_i32_32, %c8_i32 : i32
    %c1_i32_33 = arith.constant 1 : i32
    scf.for %arg5 = %c0_i32_32 to %73 step %c1_i32_33  : i32 {
      %c1_i32_39 = arith.constant 1 : i32
      %75 = arith.muli %arg5, %c1_i32_39 : i32
      %c8_i32_40 = arith.constant 8 : i32
      %76 = arith.addi %c8_i32_40, %75 : i32
      %c8_i32_41 = arith.constant 8 : i32
      %77 = arith.subi %76, %c8_i32_41 : i32
      %c7_i32_42 = arith.constant 7 : i32
      %78 = arith.andi %77, %c7_i32_42 : i32
      %c0_i32_43 = arith.constant 0 : i32
      %c0_i32_44 = arith.constant 0 : i32
      %79 = tpu.memref_slice %arg2[%c0_i32_43, %c0_i32_44] : memref<512x384xf32, #tpu.memory_space<any>> -> memref<1x384xf32, #tpu.memory_space<any>>
      %80 = tpu.memref_squeeze %79 : memref<1x384xf32, #tpu.memory_space<any>> -> memref<384xf32, #tpu.memory_space<any>>
      %c0_i32_45 = arith.constant 0 : i32
      %81 = tpu.memref_slice %arg3[%77, %c0_i32_45] : memref<16x384xf32, #tpu.memory_space<vmem>> -> memref<1x384xf32, #tpu.memory_space<vmem>>
      %82 = tpu.memref_squeeze %81 : memref<1x384xf32, #tpu.memory_space<vmem>> -> memref<384xf32, #tpu.memory_space<vmem>>
      %83 = tpu.memref_slice %arg4[%78] : memref<8x!tpu.dma_semaphore, #tpu.memory_space<semaphore_mem>> -> memref<1x!tpu.dma_semaphore, #tpu.memory_space<semaphore_mem>>
      %84 = tpu.memref_squeeze %83 : memref<1x!tpu.dma_semaphore, #tpu.memory_space<semaphore_mem>> -> memref<!tpu.dma_semaphore, #tpu.memory_space<semaphore_mem>>
      tpu.wait_dma2 semaphore(%84 : memref<!tpu.dma_semaphore, #tpu.memory_space<semaphore_mem>>) src(%80 : memref<384xf32, #tpu.memory_space<any>>) dst(%82 : memref<384xf32, #tpu.memory_space<vmem>>)
      %85 = arith.addi %0, %76 : i32
      %86 = arith.index_cast %85 : i32 to index
      %87 = memref.load %arg1[%86] : memref<16xi32, #tpu.memory_space<smem>>
      %c7_i32_46 = arith.constant 7 : i32
      %88 = arith.andi %76, %c7_i32_46 : i32
      %c0_i32_47 = arith.constant 0 : i32
      %89 = tpu.memref_slice %arg2[%87, %c0_i32_47] : memref<512x384xf32, #tpu.memory_space<any>> -> memref<1x384xf32, #tpu.memory_space<any>>
      %90 = tpu.memref_squeeze %89 : memref<1x384xf32, #tpu.memory_space<any>> -> memref<384xf32, #tpu.memory_space<any>>
      %c0_i32_48 = arith.constant 0 : i32
      %91 = tpu.memref_slice %arg3[%76, %c0_i32_48] : memref<16x384xf32, #tpu.memory_space<vmem>> -> memref<1x384xf32, #tpu.memory_space<vmem>>
      %92 = tpu.memref_squeeze %91 : memref<1x384xf32, #tpu.memory_space<vmem>> -> memref<384xf32, #tpu.memory_space<vmem>>
      %93 = tpu.memref_slice %arg4[%88] : memref<8x!tpu.dma_semaphore, #tpu.memory_space<semaphore_mem>> -> memref<1x!tpu.dma_semaphore, #tpu.memory_space<semaphore_mem>>
      %94 = tpu.memref_squeeze %93 : memref<1x!tpu.dma_semaphore, #tpu.memory_space<semaphore_mem>> -> memref<!tpu.dma_semaphore, #tpu.memory_space<semaphore_mem>>
      tpu.enqueue_dma source(%90 : memref<384xf32, #tpu.memory_space<any>>) target(%92 : memref<384xf32, #tpu.memory_space<vmem>>) target_semaphore(%94 : memref<!tpu.dma_semaphore, #tpu.memory_space<semaphore_mem>>)
    }
    %c8_i32_34 = arith.constant 8 : i32
    %c0_i32_35 = arith.constant 0 : i32
    %c8_i32_36 = arith.constant 8 : i32
    %74 = arith.addi %c0_i32_35, %c8_i32_36 : i32
    %c1_i32_37 = arith.constant 1 : i32
    scf.for %arg5 = %c0_i32_35 to %74 step %c1_i32_37  : i32 {
      %c1_i32_39 = arith.constant 1 : i32
      %75 = arith.muli %arg5, %c1_i32_39 : i32
      %c8_i32_40 = arith.constant 8 : i32
      %76 = arith.addi %c8_i32_40, %75 : i32
      %c7_i32_41 = arith.constant 7 : i32
      %77 = arith.andi %76, %c7_i32_41 : i32
      %c0_i32_42 = arith.constant 0 : i32
      %c0_i32_43 = arith.constant 0 : i32
      %78 = tpu.memref_slice %arg2[%c0_i32_42, %c0_i32_43] : memref<512x384xf32, #tpu.memory_space<any>> -> memref<1x384xf32, #tpu.memory_space<any>>
      %79 = tpu.memref_squeeze %78 : memref<1x384xf32, #tpu.memory_space<any>> -> memref<384xf32, #tpu.memory_space<any>>
      %c0_i32_44 = arith.constant 0 : i32
      %80 = tpu.memref_slice %arg3[%76, %c0_i32_44] : memref<16x384xf32, #tpu.memory_space<vmem>> -> memref<1x384xf32, #tpu.memory_space<vmem>>
      %81 = tpu.memref_squeeze %80 : memref<1x384xf32, #tpu.memory_space<vmem>> -> memref<384xf32, #tpu.memory_space<vmem>>
      %82 = tpu.memref_slice %arg4[%77] : memref<8x!tpu.dma_semaphore, #tpu.memory_space<semaphore_mem>> -> memref<1x!tpu.dma_semaphore, #tpu.memory_space<semaphore_mem>>
      %83 = tpu.memref_squeeze %82 : memref<1x!tpu.dma_semaphore, #tpu.memory_space<semaphore_mem>> -> memref<!tpu.dma_semaphore, #tpu.memory_space<semaphore_mem>>
      tpu.wait_dma2 semaphore(%83 : memref<!tpu.dma_semaphore, #tpu.memory_space<semaphore_mem>>) src(%79 : memref<384xf32, #tpu.memory_space<any>>) dst(%81 : memref<384xf32, #tpu.memory_space<vmem>>)
    }
    %c8_i32_38 = arith.constant 8 : i32
    return
  }
  func.func @transform_1(%arg0: i32, %arg1: memref<16xi32, #tpu.memory_space<smem>>) -> (i32, i32) {
    %c0_i32 = arith.constant 0 : i32
    %c0_i32_0 = arith.constant 0 : i32
    return %arg0, %c0_i32 : i32, i32
  }
}

</mosaic_0001>

<bundles_post_ra>
// kernel: tpu_custom_call.1
= control target key start
LH: loop header
LB: loop body
LE: loop exit
PB: predicated region body
PF: predicated region fallthrough
CT: control target
= control target key end

     0   :  { %s865_s0 = inlined_call_operand.hbm [shape: s32[16], index: 0, kind: input, shape index: {}]   ;;  %s866_s1 = inlined_call_operand.hbm [shape: f32[512,384], index: 1, kind: input, shape index: {}]   ;;  %s867_s2 = inlined_call_operand.hbm [shape: f32[16,384], index: 2, kind: output, shape index: {}]  }
   0x1   :  { %s350_s11 = scalar_lea.hbm %s865_s0, 16 }
   0x2   :  { %p351_p0 = scmp.ne.s32.totalorder %s865_s0, %s350_s11  ;;  %p354_p1 = scmp.lt.u32.totalorder %s350_s11, %s865_s0 }
   0x4   :  { %p356_p2 = pnand %p354_p1, %p351_p0 }
   0x6   :  { %359 = shalt.err (!%p356_p2)  }
   0x7   :  { %s622_s16 = smov [#allocation4]  }
   0x8   :  { %8 = dma.hbm_to_smem %s865_s0, 16, %s622_s16, [#allocation3] }
   0x9   :  { %606 = dma.done.wait [#allocation3], 16 }
   0xa   :  { %607 = vsyncadd [#allocation3], 4294967280 }
   0xb   :  { %10 = sfence }
   0xc   :  { %11 = vsyncpa [#allocation6], 0  ;;  %s13_s19 = sld [smem:[#allocation4]]  ;;  %s623_s20 = smov [#allocation5]  }
   0xd   :  { %s21_s21 = sshll.u32 %s623_s20, 4  ;;  %s666_s22 = sld [smem:[#allocation4 + $0x1]]  ;;  %s664_s21 = int_to_ptr.vmem [resolvable:$true] %s21_s21 }
   0xe   :  { %s624_s23 = smov [#allocation5 + $0x1]   ;;  %s668_s25 = sld [smem:[#allocation4 + $0x2]] }
   0xf   :  { %s36_s24 = sshll.u32 %s624_s23, 4  ;;  %s625_s28 = smov [#allocation5 + $0x2]   ;;  %s670_s24 = int_to_ptr.vmem [resolvable:$true] %s36_s24 }
  0x10   :  { %s51_s29 = sshll.u32 %s625_s28, 4  ;;  %s674_s30 = sld [smem:[#allocation4 + $0x3]]  ;;  %s672_s29 = int_to_ptr.vmem [resolvable:$true] %s51_s29 }
  0x11   :  { %s684_s14 = scalar_lea.hbm %s866_s1, 24576 }
  0x12   :  { %s14_s0 = sshrl.u32 %s13_s19, 3  ;;  %s15_s26 = sand.u32 7, %s13_s19  }
  0x13   :  { %s16_s27 = smul.u32 24, %s14_s0  ;;  %s27_s4 = sshrl.u32 %s666_s22, 3 }
  0x14   :  { %s28_s6 = sand.u32 7, %s666_s22   ;;  %s29_s10 = smul.u32 24, %s27_s4 }
  0x15   :  { %s17_s3 = sadd.s32 %s16_s27, %s15_s26 }
  0x16   :  { %s295_s5 = sshll.u32 %s17_s3, 4 }
  0x17   :  { %s19_s9 = scalar_lea.hbm %s866_s1, %s295_s5 }
  0x18   :  { %s360_s11 = scalar_lea.hbm %s19_s9, 48  ;;  %p363_p4 = scmp.lt.u32.totalorder %s19_s9, %s866_s1 }
  0x19   :  { %p361_p3 = scmp.ne.s32.totalorder %s19_s9, %s360_s11  ;;  %p364_p5 = scmp.lt.u32.totalorder %s684_s14, %s360_s11 }
  0x1a   :  { %p366_p7 = scmp.lt.u32.totalorder %s360_s11, %s19_s9 }
  0x1b   :  { %p365_p6 = por %p364_p5, %p363_p4 }
  0x1d   :  { %p367_p8 = por %p366_p7, %p365_p6 }
  0x1f   :  { %p368_p9 = pnand %p367_p8, %p361_p3 }
  0x21   :  { %371 = shalt.err (!%p368_p9)  }
  0x22   :  { %s372_s17 = scalar_lea.vmem %s664_s21, 48  ;;  %s693_s18 = scalar_lea.vmem %s664_s21, 768 }
  0x23   :  { %p373_p10 = scmp.ne.s32.totalorder %s664_s21, %s372_s17  ;;  %p377_p11 = scmp.lt.s32.totalorder %s664_s21, %s664_s21 }
  0x24   :  { %p378_p12 = scmp.lt.s32.totalorder %s693_s18, %s372_s17 }
  0x26   :  { %p379_p13 = por %p378_p12, %p377_p11 }
  0x28   :  { %p380_p0 = pnand %p379_p13, %p373_p10 }
  0x2a   :  { %383 = shalt.err (!%p380_p0)  }
  0x2b   :  { %s626_s19 = smov 128   ;;  %s627_s20 = smov 1  }
  0x2c   :  { %24 = dma.hbm_to_vmem [thread:$0]  %s19_s9, 48, %s664_s21, [#allocation2], %s626_s19, %s626_s19, %s627_s20 }
  0x2d   :  { %s30_s22 = sadd.s32 %s29_s10, %s28_s6  ;;  %s42_s23 = sshrl.u32 %s668_s25, 3 }
  0x2e   :  { %s297_s0 = sshll.u32 %s30_s22, 4  ;;  %s43_s26 = sand.u32 7, %s668_s25  }
  0x2f   :  { %s32_s3 = scalar_lea.hbm %s866_s1, %s297_s0  ;;  %s44_s4 = smul.u32 24, %s42_s23 }
  0x30   :  { %s384_s5 = scalar_lea.hbm %s32_s3, 48  ;;  %p387_p2 = scmp.lt.u32.totalorder %s32_s3, %s866_s1 }
  0x31   :  { %p385_p1 = scmp.ne.s32.totalorder %s32_s3, %s384_s5  ;;  %p388_p3 = scmp.lt.u32.totalorder %s684_s14, %s384_s5 }
  0x32   :  { %p390_p5 = scmp.lt.u32.totalorder %s384_s5, %s32_s3 }
  0x33   :  { %p389_p4 = por %p388_p3, %p387_p2 }
  0x35   :  { %p391_p6 = por %p390_p5, %p389_p4 }
  0x37   :  { %p392_p7 = pnand %p391_p6, %p385_p1 }
  0x39   :  { %395 = shalt.err (!%p392_p7)  }
  0x3a   :  { %s396_s25 = scalar_lea.vmem %s670_s24, 48  ;;  %p401_p9 = scmp.lt.s32.totalorder %s670_s24, %s664_s21 }
  0x3b   :  { %p397_p8 = scmp.ne.s32.totalorder %s670_s24, %s396_s25  ;;  %p402_p10 = scmp.lt.s32.totalorder %s693_s18, %s396_s25 }
  0x3d   :  { %p403_p12 = por %p402_p10, %p401_p9 }
  0x3f   :  { %p404_p13 = pnand %p403_p12, %p397_p8 }
  0x41   :  { %407 = shalt.err (!%p404_p13)  }
  0x42   :  { %39 = dma.hbm_to_vmem [thread:$0]  %s32_s3, 48, %s670_s24, [#allocation2 + $0x1], %s626_s19, %s626_s19, %s627_s20 }
  0x43   :  { %s45_s6 = sadd.s32 %s44_s4, %s43_s26  ;;  %s57_s9 = sshrl.u32 %s674_s30, 3 }
  0x44   :  { %s299_s10 = sshll.u32 %s45_s6, 4  ;;  %s58_s11 = sand.u32 7, %s674_s30  }
  0x45   :  { %s47_s15 = scalar_lea.hbm %s866_s1, %s299_s10  ;;  %s59_s16 = smul.u32 24, %s57_s9 }
  0x46   :  { %s408_s17 = scalar_lea.hbm %s47_s15, 48  ;;  %p411_p1 = scmp.lt.u32.totalorder %s47_s15, %s866_s1 }
  0x47   :  { %p409_p0 = scmp.ne.s32.totalorder %s47_s15, %s408_s17  ;;  %p412_p2 = scmp.lt.u32.totalorder %s684_s14, %s408_s17 }
  0x48   :  { %p414_p4 = scmp.lt.u32.totalorder %s408_s17, %s47_s15 }
  0x49   :  { %p413_p3 = por %p412_p2, %p411_p1 }
  0x4b   :  { %p415_p5 = por %p414_p4, %p413_p3 }
  0x4d   :  { %p416_p6 = pnand %p415_p5, %p409_p0 }
  0x4f   :  { %419 = shalt.err (!%p416_p6)  }
  0x50   :  { %s420_s24 = scalar_lea.vmem %s672_s29, 48  ;;  %p425_p8 = scmp.lt.s32.totalorder %s672_s29, %s664_s21 }
  0x51   :  { %p421_p7 = scmp.ne.s32.totalorder %s672_s29, %s420_s24  ;;  %p426_p9 = scmp.lt.s32.totalorder %s693_s18, %s420_s24 }
  0x53   :  { %p427_p10 = por %p426_p9, %p425_p8 }
  0x55   :  { %p428_p12 = pnand %p427_p10, %p421_p7 }
  0x57   :  { %431 = shalt.err (!%p428_p12)  }
  0x58   :  { %54 = dma.hbm_to_vmem [thread:$0]  %s47_s15, 48, %s672_s29, [#allocation2 + $0x2], %s626_s19, %s626_s19, %s627_s20 }
  0x59   :  { %s60_s30 = sadd.s32 %s59_s16, %s58_s11  ;;  %s628_s26 = smov [#allocation5 + $0x3]  }
  0x5a   :  { %s301_s0 = sshll.u32 %s60_s30, 4  ;;  %s66_s27 = sshll.u32 %s628_s26, 4  ;;  %s67_s27 = int_to_ptr.vmem [resolvable:$true] %s66_s27 }
  0x5b   :  { %s62_s4 = scalar_lea.hbm %s866_s1, %s301_s0 }
  0x5c   :  { %s432_s5 = scalar_lea.hbm %s62_s4, 48  ;;  %p435_p0 = scmp.lt.u32.totalorder %s62_s4, %s866_s1 }
  0x5d   :  { %p433_p13 = scmp.ne.s32.totalorder %s62_s4, %s432_s5  ;;  %p436_p1 = scmp.lt.u32.totalorder %s684_s14, %s432_s5 }
  0x5e   :  { %p438_p3 = scmp.lt.u32.totalorder %s432_s5, %s62_s4 }
  0x5f   :  { %p437_p2 = por %p436_p1, %p435_p0 }
  0x61   :  { %p439_p4 = por %p438_p3, %p437_p2 }
  0x63   :  { %p440_p5 = pnand %p439_p4, %p433_p13 }
  0x65   :  { %443 = shalt.err (!%p440_p5)  }
  0x66   :  { %s444_s29 = scalar_lea.vmem %s67_s27, 48  ;;  %p449_p7 = scmp.lt.s32.totalorder %s67_s27, %s664_s21 }
  0x67   :  { %p445_p6 = scmp.ne.s32.totalorder %s67_s27, %s444_s29  ;;  %p450_p8 = scmp.lt.s32.totalorder %s693_s18, %s444_s29 }
  0x69   :  { %p451_p9 = por %p450_p8, %p449_p7 }
  0x6b   :  { %p452_p10 = pnand %p451_p9, %p445_p6 }
  0x6d   :  { %455 = shalt.err (!%p452_p10)  }
  0x6e   :  { %69 = dma.hbm_to_vmem [thread:$0]  %s62_s4, 48, %s67_s27, [#allocation2 + $0x3], %s626_s19, %s626_s19, %s627_s20 }
  0x6f   :  { %s302_s25 = sld [smem:[#allocation4 + $0x4]]  ;;  %s629_s6 = smov [#allocation5 + $0x4]  }
  0x70   :  { %s81_s9 = sshll.u32 %s629_s6, 4  ;;  %s304_s10 = sld [smem:[#allocation4 + $0x5]]  ;;  %s753_s9 = int_to_ptr.vmem [resolvable:$true] %s81_s9 }
  0x71   :  { %s630_s11 = smov [#allocation5 + $0x5]   ;;  %s755_s13 = sld [smem:[#allocation4 + $0x6]] }
  0x72   :  { %s96_s12 = sshll.u32 %s630_s11, 4  ;;  %s631_s15 = smov [#allocation5 + $0x6]   ;;  %s757_s12 = int_to_ptr.vmem [resolvable:$true] %s96_s12 }
  0x73   :  { %s759_s16 = sshll.u32 %s631_s15, 4  ;;  %s761_s17 = sld [smem:[#allocation4 + $0x7]]  ;;  %s112_s16 = int_to_ptr.vmem [resolvable:$true] %s759_s16 }
  0x75   :  { %s72_s22 = sshrl.u32 %s302_s25, 3  ;;  %s73_s23 = sand.u32 7, %s302_s25  }
  0x76   :  { %s74_s24 = smul.u32 24, %s72_s22  ;;  %s87_s30 = sshrl.u32 %s304_s10, 3 }
  0x77   :  { %s88_s0 = sand.u32 7, %s304_s10   ;;  %s89_s26 = smul.u32 24, %s87_s30 }
  0x78   :  { %s75_s27 = sadd.s32 %s74_s24, %s73_s23  ;;  %s102_s28 = sshrl.u32 %s755_s13, 3 }
  0x79   :  { %s303_s3 = sshll.u32 %s75_s27, 4  ;;  %s90_s4 = sadd.s32 %s89_s26, %s88_s0 }
  0x7a   :  { %s77_s8 = scalar_lea.hbm %s866_s1, %s303_s3  ;;  %s305_s29 = sshll.u32 %s90_s4, 4 }
  0x7b   :  { %s456_s6 = scalar_lea.hbm %s77_s8, 48  ;;  %p459_p13 = scmp.lt.u32.totalorder %s77_s8, %s866_s1 }
  0x7c   :  { %p457_p12 = scmp.ne.s32.totalorder %s77_s8, %s456_s6  ;;  %p460_p0 = scmp.lt.u32.totalorder %s684_s14, %s456_s6 }
  0x7d   :  { %p462_p2 = scmp.lt.u32.totalorder %s456_s6, %s77_s8 }
  0x7e   :  { %p461_p1 = por %p460_p0, %p459_p13 }
  0x80   :  { %p463_p3 = por %p462_p2, %p461_p1 }
  0x82   :  { %p464_p4 = pnand %p463_p3, %p457_p12 }
  0x84   :  { %467 = shalt.err (!%p464_p4)  }
  0x85   :  { %s468_s25 = scalar_lea.vmem %s753_s9, 48  ;;  %p473_p6 = scmp.lt.s32.totalorder %s753_s9, %s664_s21 }
  0x86   :  { %p469_p5 = scmp.ne.s32.totalorder %s753_s9, %s468_s25  ;;  %p474_p7 = scmp.lt.s32.totalorder %s693_s18, %s468_s25 }
  0x88   :  { %p475_p8 = por %p474_p7, %p473_p6 }
  0x8a   :  { %p476_p9 = pnand %p475_p8, %p469_p5 }
  0x8c   :  { %479 = shalt.err (!%p476_p9)  }
  0x8d   :  { %84 = dma.hbm_to_vmem [thread:$0]  %s77_s8, 48, %s753_s9, [#allocation2 + $0x4], %s626_s19, %s626_s19, %s627_s20 }
  0x8e   :  { %s92_s23 = scalar_lea.hbm %s866_s1, %s305_s29  ;;  %s103_s24 = sand.u32 7, %s755_s13  }
  0x8f   :  { %s480_s30 = scalar_lea.hbm %s92_s23, 48  ;;  %p483_p12 = scmp.lt.u32.totalorder %s92_s23, %s866_s1 }
  0x90   :  { %p481_p10 = scmp.ne.s32.totalorder %s92_s23, %s480_s30  ;;  %p484_p13 = scmp.lt.u32.totalorder %s684_s14, %s480_s30 }
  0x91   :  { %p486_p1 = scmp.lt.u32.totalorder %s480_s30, %s92_s23 }
  0x92   :  { %p485_p0 = por %p484_p13, %p483_p12 }
  0x94   :  { %p487_p2 = por %p486_p1, %p485_p0 }
  0x96   :  { %p488_p3 = pnand %p487_p2, %p481_p10 }
  0x98   :  { %491 = shalt.err (!%p488_p3)  }
  0x99   :  { %s492_s9 = scalar_lea.vmem %s757_s12, 48  ;;  %p497_p5 = scmp.lt.s32.totalorder %s757_s12, %s664_s21 }
  0x9a   :  { %p493_p4 = scmp.ne.s32.totalorder %s757_s12, %s492_s9  ;;  %p498_p6 = scmp.lt.s32.totalorder %s693_s18, %s492_s9 }
  0x9c   :  { %p499_p7 = por %p498_p6, %p497_p5 }
  0x9e   :  { %p500_p8 = pnand %p499_p7, %p493_p4 }
  0xa0   :  { %503 = shalt.err (!%p500_p8)  }
  0xa1   :  { %99 = dma.hbm_to_vmem [thread:$0]  %s92_s23, 48, %s757_s12, [#allocation2 + $0x5], %s626_s19, %s626_s19, %s627_s20 }
  0xa2   :  { %s104_s27 = smul.u32 24, %s102_s28  ;;  %s117_s3 = sshrl.u32 %s761_s17, 3 }
  0xa3   :  { %s118_s4 = sand.u32 7, %s761_s17   ;;  %s119_s7 = smul.u32 24, %s117_s3 }
  0xa4   :  { %s105_s5 = sadd.s32 %s104_s27, %s103_s24 }
  0xa5   :  { %s307_s8 = sshll.u32 %s105_s5, 4  ;;  %s120_s15 = sadd.s32 %s119_s7, %s118_s4 }
  0xa6   :  { %s107_s11 = scalar_lea.hbm %s866_s1, %s307_s8 }
  0xa7   :  { %s504_s25 = scalar_lea.hbm %s107_s11, 48  ;;  %p507_p10 = scmp.lt.u32.totalorder %s107_s11, %s866_s1 }
  0xa8   :  { %p505_p9 = scmp.ne.s32.totalorder %s107_s11, %s504_s25  ;;  %p508_p12 = scmp.lt.u32.totalorder %s684_s14, %s504_s25 }
  0xa9   :  { %p510_p0 = scmp.lt.u32.totalorder %s504_s25, %s107_s11 }
  0xaa   :  { %p509_p13 = por %p508_p12, %p507_p10 }
  0xac   :  { %p511_p1 = por %p510_p0, %p509_p13 }
  0xae   :  { %p512_p2 = pnand %p511_p1, %p505_p9 }
  0xb0   :  { %515 = shalt.err (!%p512_p2)  }
  0xb1   :  { %s516_s12 = scalar_lea.vmem %s112_s16, 48  ;;  %p521_p4 = scmp.lt.s32.totalorder %s112_s16, %s664_s21 }
  0xb2   :  { %p517_p3 = scmp.ne.s32.totalorder %s112_s16, %s516_s12  ;;  %p522_p5 = scmp.lt.s32.totalorder %s693_s18, %s516_s12 }
  0xb4   :  { %p523_p6 = por %p522_p5, %p521_p4 }
  0xb6   :  { %p524_p7 = pnand %p523_p6, %p517_p3 }
  0xb8   :  { %527 = shalt.err (!%p524_p7)  }
  0xb9   :  { %114 = dma.hbm_to_vmem [thread:$0]  %s107_s11, 48, %s112_s16, [#allocation2 + $0x6], %s626_s19, %s626_s19, %s627_s20 }
  0xba   :  { %s309_s13 = sshll.u32 %s120_s15, 4  ;;  %s632_s17 = smov [#allocation5 + $0x7]  }
  0xbb   :  { %s126_s28 = sshll.u32 %s632_s17, 4  ;;  %s122_s30 = scalar_lea.hbm %s866_s1, %s309_s13  ;;  %s127_s28 = int_to_ptr.vmem [resolvable:$true] %s126_s28 }
  0xbc   :  { %s528_s0 = scalar_lea.hbm %s122_s30, 48  ;;  %p531_p9 = scmp.lt.u32.totalorder %s122_s30, %s866_s1 }
  0xbd   :  { %p529_p8 = scmp.ne.s32.totalorder %s122_s30, %s528_s0  ;;  %p532_p10 = scmp.lt.u32.totalorder %s684_s14, %s528_s0 }
  0xbe   :  { %p534_p13 = scmp.lt.u32.totalorder %s528_s0, %s122_s30 }
  0xbf   :  { %p533_p12 = por %p532_p10, %p531_p9 }
  0xc1   :  { %p535_p0 = por %p534_p13, %p533_p12 }
  0xc3   :  { %p536_p1 = pnand %p535_p0, %p529_p8 }
  0xc5   :  { %539 = shalt.err (!%p536_p1)  }
  0xc6   :  { %s540_s16 = scalar_lea.vmem %s127_s28, 48  ;;  %p545_p3 = scmp.lt.s32.totalorder %s127_s28, %s664_s21 }
  0xc7   :  { %p541_p2 = scmp.ne.s32.totalorder %s127_s28, %s540_s16  ;;  %p546_p4 = scmp.lt.s32.totalorder %s693_s18, %s540_s16 }
  0xc9   :  { %p547_p5 = por %p546_p4, %p545_p3 }
  0xcb   :  { %p548_p6 = pnand %p547_p5, %p541_p2 }
  0xcd   :  { %551 = shalt.err (!%p548_p6)  }
  0xce   :  { %129 = dma.hbm_to_vmem [thread:$0]  %s122_s30, 48, %s127_s28, [#allocation2 + $0x7], %s626_s19, %s626_s19, %s627_s20 }
  0xcf   :  { %s826_s27 = smov 0  }
  0xd0 LB: > { %s136_s3 = sadd.s32 8, %s616_s27  ;;  %s137_s4 = sand.u32 7, %s616_s27  ;;  %s616_s27 = sphi %s826_s27, %s135_s27  }
  0xd1   : > { %s138_s5 = scalar_lea.sflag [#allocation2], %s137_s4 }
  0xd2   : > { %608 = dma.done.wait %s138_s5, 48 }
  0xd3   : > { %609 = vsyncadd %s138_s5, 4294967248  ;;  %s143_s7 = sand.u32 7, %s136_s3  ;;  %s150_s8 = sshrl.u32 %s136_s3, 3 }
  0xd4   : > { %s142_s29 = sld [smem:[#allocation4 + %s136_s3]]  ;;  %s152_s6 = smul.u32 24, %s150_s8 }
  0xd5   : > { %s155_s23 = scalar_lea.sflag [#allocation2], %s143_s7 }
  0xd6   : > { %s153_s19 = sadd.s32 %s152_s6, %s143_s7 }
  0xd7   : > { %s154_s20 = scalar_lea.vmem [#allocation5], %s153_s19 }
  0xd8   : > { %s157_s11 = sshll.u32 %s154_s20, 4  ;;  %s158_s11 = int_to_ptr.vmem [resolvable:$true] %s157_s11 }
  0xda   : > { %s144_s15 = sshrl.u32 %s142_s29, 3  ;;  %s145_s25 = sand.u32 7, %s142_s29  }
  0xdb   : > { %s146_s10 = smul.u32 24, %s144_s15 }
  0xdd   : > { %s147_s22 = sadd.s32 %s146_s10, %s145_s25 }
  0xde   : > { %s310_s12 = sshll.u32 %s147_s22, 4 }
  0xdf   : > { %s149_s28 = scalar_lea.hbm %s866_s1, %s310_s12 }
  0xe0   : > { %s552_s24 = scalar_lea.hbm %s149_s28, 48  ;;  %p555_p8 = scmp.lt.u32.totalorder %s149_s28, %s866_s1 }
  0xe1   : > { %p553_p7 = scmp.ne.s32.totalorder %s149_s28, %s552_s24  ;;  %p556_p9 = scmp.lt.u32.totalorder %s684_s14, %s552_s24 }
  0xe2   : > { %p558_p12 = scmp.lt.u32.totalorder %s552_s24, %s149_s28 }
  0xe3   : > { %p557_p10 = por %p556_p9, %p555_p8 }
  0xe5   : > { %p559_p13 = por %p558_p12, %p557_p10 }
  0xe7   : > { %p560_p0 = pnand %p559_p13, %p553_p7 }
  0xe9   : > { %563 = shalt.err (!%p560_p0)  }
  0xea   : > { %s564_s26 = scalar_lea.vmem %s158_s11, 48  ;;  %p569_p2 = scmp.lt.s32.totalorder %s158_s11, %s664_s21 }
  0xeb   : > { %p565_p1 = scmp.ne.s32.totalorder %s158_s11, %s564_s26  ;;  %p570_p3 = scmp.lt.s32.totalorder %s693_s18, %s564_s26 }
  0xed   : > { %p571_p4 = por %p570_p3, %p569_p2 }
  0xef   : > { %p572_p5 = pnand %p571_p4, %p565_p1 }
  0xf1   : > { %575 = shalt.err (!%p572_p5)  }
  0xf2   : > { %s633_s9 = smov 128   ;;  %s634_s16 = smov 1  }
  0xf3   : > { %160 = dma.hbm_to_vmem [thread:$0]  %s149_s28, 48, %s158_s11, %s155_s23, %s633_s9, %s633_s9, %s634_s16 }
  0xf4   : > { %s135_s27 = sadd.s32 1, %s616_s27  }
  0xf5   : > { %p132_p6 = scmp.ge.s32.totalorder %s135_s27, 8  }
  0xf6   :  { %s618_s3 = smov (%p132_p6), 0  }
  0xf7   :  { %134 = sbr.rel (!%p132_p6) target bundleno = 208 (0xd0), region = 68 }
  0xfe LB: > { %s167_s4 = sadd.s32 8, %s620_s3  ;;  %s620_s3 = sphi %s618_s3, %s166_s3  }
  0xff   : > { %s168_s5 = sand.u32 7, %s167_s4 }
 0x100   : > { %s169_s7 = scalar_lea.sflag [#allocation2], %s168_s5 }
 0x101   : > { %610 = dma.done.wait %s169_s7, 48 }
 0x102   : > { %611 = vsyncadd %s169_s7, 4294967248  ;;  %s166_s3 = sadd.s32 1, %s620_s3  }
 0x103   : > { %p163_p7 = scmp.ge.s32.totalorder %s166_s3, 8  }
 0x104   :  { %p577_p8 = scmp.ne.s32.totalorder (%p163_p7), %s664_s21, %s693_s18  ;;  %p582_p9 = scmp.lt.s32.totalorder (%p163_p7), %s693_s18, %s693_s18 }
 0x105   :  { %165 = sbr.rel (!%p163_p7) target bundleno = 254 (0xfe), region = 79 }
 0x106   :  { %p583_p10 = por (%p163_p7), %p582_p9, %p377_p11 }
 0x108   :  { %p584_p12 = pnand (%p163_p7), %p583_p10, %p577_p8 }
 0x10c   :  { %587 = shalt.err (!%p584_p12)
}
 0x10d   :  { %s588_s27 = scalar_lea.hbm %s867_s2, 768 }
 0x10e   :  { %p589_p13 = scmp.ne.s32.totalorder %s867_s2, %s588_s27  ;;  %p592_p0 = scmp.lt.u32.totalorder %s588_s27, %s867_s2 }
 0x110   :  { %p594_p1 = pnand %p592_p0, %p589_p13 }
 0x112   :  { %597 = shalt.err (!%p594_p1)
}
 0x113   :  { %s635_s20 = smov 384   ;;  %s636_s18 = smov 24  }
 0x114   :  { %183 = dma.vmem_to_hbm [thread:$0]  %s664_s21, 768, %s867_s2, [#allocation6], %s635_s20, %s635_s20, %s636_s18  }
 0x115   :  { %612 = dma.done.wait [#allocation6], 768  }
 0x116   :  { %613 = vsyncadd [#allocation6], 4294966528 }
 0x117   :  { %187 = vsyncpa [#allocation6], 1 }
 0x118   :  { %188 = vsyncmov [#allocation2] }
 0x11b   :  { %s189_s25 = vpop.sfrf %188 }
 0x11c   :  { %p311_p11 = scmp.ne.s32.totalorder %s189_s25, 0 }
 0x11e   :  { %193 = shalt.err (%p311_p11)  }
 0x11f   :  { %195 = vsyncmov [#allocation2 + $0x1] }
 0x122   :  { %s196_s10 = vpop.sfrf %195 }
 0x123   :  { %p312_p2 = scmp.ne.s32.totalorder %s196_s10, 0 }
 0x125   :  { %200 = shalt.err (%p312_p2)  }
 0x126   :  { %202 = vsyncmov [#allocation2 + $0x2] }
 0x129   :  { %s203_s22 = vpop.sfrf %202 }
 0x12a   :  { %p313_p3 = scmp.ne.s32.totalorder %s203_s22, 0 }
 0x12c   :  { %207 = shalt.err (%p313_p3)  }
 0x12d   :  { %209 = vsyncmov [#allocation2 + $0x3] }
 0x130   :  { %s210_s12 = vpop.sfrf %209 }
 0x131   :  { %p314_p4 = scmp.ne.s32.totalorder %s210_s12, 0 }
 0x133   :  { %214 = shalt.err (%p314_p4)  }
 0x134   :  { %216 = vsyncmov [#allocation2 + $0x4] }
 0x137   :  { %s217_s2 = vpop.sfrf %216 }
 0x138   :  { %p315_p5 = scmp.ne.s32.totalorder %s217_s2, 0 }
 0x13a   :  { %221 = shalt.err (%p315_p5)  }
 0x13b   :  { %223 = vsyncmov [#allocation2 + $0x5] }
 0x13e   :  { %s224_s21 = vpop.sfrf %223 }
 0x13f   :  { %p316_p6 = scmp.ne.s32.totalorder %s224_s21, 0 }
 0x141   :  { %228 = shalt.err (%p316_p6)  }
 0x142   :  { %230 = vsyncmov [#allocation2 + $0x6] }
 0x145   :  { %s231_s13 = vpop.sfrf %230 }
 0x146   :  { %p317_p7 = scmp.ne.s32.totalorder %s231_s13, 0 }
 0x148   :  { %235 = shalt.err (%p317_p7)  }
 0x149   :  { %237 = vsyncmov [#allocation2 + $0x7] }
 0x14c   :  { %s238_s17 = vpop.sfrf %237 }
 0x14d   :  { %p318_p8 = scmp.ne.s32.totalorder %s238_s17, 0 }
 0x14f   :  { %242 = shalt.err (%p318_p8)  }

</bundles_post_ra>
